<compile_context>
chip_gen: v6e
topology: v6e:2x2x1
jax: 0.10.0
libtpu: 0.0.40
codegen_flags: <defaults>
</compile_context>

<pallas_src>
import math

import jax
import jax.numpy as jnp
import numpy as np
from jax.experimental import pallas as pl
from jax.experimental.pallas import tpu as pltpu

DIM = 32            # self.dim in VNet
HALF = DIM // 2     # 16
DATA_DIM = 2
HIDDEN = 128
LOG10000 = math.log(10000.0)

NSRC = 6            # scalar sources: vt0, vt1, t_v, xt0, xt1, t
NSRC_PAD = 8        # padded source count (lane-friendly)
ANG_W = NSRC_PAD * HALF          # 128 angle columns
H1_PAD = 256                     # front-end hidden width (192 real + pad)
CAT_W = 4 * DIM                  # 128 = width of concatenated features
FC1_OUT = 2 * HIDDEN             # 256
TILE_B_DEFAULT = 512


def _gelu(x):
    # Exact (erf-based) GELU, matching torch.nn.GELU() default.
    return 0.5 * x * (1.0 + jax.lax.erf(x * (1.0 / math.sqrt(2.0))))


def _vnet_kernel(
    s_ref,                                     # (TB, 8)   stacked scalar sources
    fmap_ref,                                  # (8, 128)  source -> angle map
    wsin_ref, wcos_ref, b1_ref,                # (128,256),(128,256),(1,256)
    w2_ref, b2_ref,                            # (256,128),(1,128)
    fc1_w_ref, fc1_b_ref,                      # (128,256),(1,256)
    fc2_w_ref, fc2_b_ref,                      # (256,128),(1,128)
    fc3_w_ref, fc3_b_ref,                      # (128,128),(1,128)  zero-padded
    out_ref,                                   # (TB, 128) lane-dense output
):
    # (TB, 128) angle matrix: one matmul replaces 6 separate broadcasts.
    ang = jnp.dot(s_ref[...], fmap_ref[...], preferred_element_type=jnp.float32)

    # Fused front-end first layer (all 4 MLPs at once, block-diagonal weights).
    h1 = (jnp.dot(jnp.sin(ang), wsin_ref[...], preferred_element_type=jnp.float32)
          + jnp.dot(jnp.cos(ang), wcos_ref[...], preferred_element_type=jnp.float32)
          + b1_ref[...])
    h1 = _gelu(h1)

    # Fused front-end second layer; output column order is already
    # [vt_feat, tv_feat, xt_feat, t_feat] -> no concat needed.
    x = jnp.dot(h1, w2_ref[...], preferred_element_type=jnp.float32) + b2_ref[...]

    # Head MLP. (bf16 casts on fc1/fc2 would be a further win on v6e/v7x.)
    h = _gelu(jnp.dot(x, fc1_w_ref[...], preferred_element_type=jnp.float32)
              + fc1_b_ref[...])
    h = _gelu(jnp.dot(h, fc2_w_ref[...], preferred_element_type=jnp.float32)
              + fc2_b_ref[...])
    out_ref[...] = (jnp.dot(h, fc3_w_ref[...], preferred_element_type=jnp.float32)
                    + fc3_b_ref[...])


# ---------------------- host-side parameter packing -------------------------
def pack_params(params):
    """Pack the 22 raw VNet params into 12 fused, lane-dense arrays."""
    (dt_w1, dt_b1, dt_w2, dt_b2,
     vt_w1, vt_b1, vt_w2, vt_b2,
     dm_w1, dm_b1, dm_w2, dm_b2,
     vm_w1, vm_b1, vm_w2, vm_b2,
     fc1_w, fc1_b, fc2_w, fc2_b, fc3_w, fc3_b) = [
        np.asarray(p, np.float32) for p in params]

    freqs = np.exp(-(LOG10000 / (HALF - 1)) * np.arange(HALF, dtype=np.float32))

    # Scalar-source order: [vt0, vt1, t_v, xt0, xt1, t]
    src_l1 = [(vm_w1, vm_b1), (vm_w1, vm_b1), (vt_w1, vt_b1),
              (dm_w1, dm_b1), (dm_w1, dm_b1), (dt_w1, dt_b1)]

    fmap = np.zeros((NSRC_PAD, ANG_W), np.float32)       # (8, 128)
    wsin = np.zeros((ANG_W, H1_PAD), np.float32)         # (128, 256)
    wcos = np.zeros((ANG_W, H1_PAD), np.float32)
    b1 = np.zeros((1, H1_PAD), np.float32)
    for j, (w1, bb1) in enumerate(src_l1):
        fmap[j, j * HALF:(j + 1) * HALF] = freqs
        wsin[j * HALF:(j + 1) * HALF, j * DIM:(j + 1) * DIM] = w1[:HALF, :]
        wcos[j * HALF:(j + 1) * HALF, j * DIM:(j + 1) * DIM] = w1[HALF:, :]
        b1[0, j * DIM:(j + 1) * DIM] = bb1[0]

    # Second fused layer -> x columns [vt_feat | tv_feat | xt_feat | t_feat]
    w2 = np.zeros((H1_PAD, CAT_W), np.float32)           # (256, 128)
    w2[0:64,    0:32]  = vm_w2     # v_mlp Linear(64,32) on flattened vt hidden
    w2[64:96,   32:64] = vt_w2     # v_time_mlp Linear(32,32)
    w2[96:160,  64:96] = dm_w2     # data_mlp Linear(64,32)
    w2[160:192, 96:128] = dt_w2    # data_time_mlp Linear(32,32)
    b2 = np.concatenate([vm_b2, vt_b2, dm_b2, dt_b2], axis=1)  # (1, 128)

    # Lane-dense fc3 (zero-padded columns; wrapper slices [:, :DATA_DIM]).
    fc3_wp = np.zeros((HIDDEN, HIDDEN), np.float32)
    fc3_wp[:, :DATA_DIM] = fc3_w
    fc3_bp = np.zeros((1, HIDDEN), np.float32)
    fc3_bp[0, :DATA_DIM] = fc3_b[0]

    arrs = (fmap, wsin, wcos, b1, w2, b2,
            fc1_w, fc1_b, fc2_w, fc2_b, fc3_wp, fc3_bp)
    return tuple(jnp.asarray(a) for a in arrs)


def _round_up(x, m):
    return ((x + m - 1) // m) * m


def vnet_forward(vt, t_v, xt, t, packed_params, *, tile_b=TILE_B_DEFAULT):
    """vt: (B, 2), t_v: (B, 1), xt: (B, 2), t: (B, 1) -> (B, 2)."""
    B = vt.shape[0]

    # Stack the 6 scalar sources into one lane-packed (B, 8) activation input.
    s = jnp.concatenate(
        [vt, t_v, xt, t, jnp.zeros((B, NSRC_PAD - NSRC), jnp.float32)], axis=1)

    tb = min(tile_b, _round_up(B, 8))          # multiple of 8 (f32 sublanes)
    Bp = _round_up(B, tb)
    if Bp != B:
        s = jnp.pad(s, ((0, Bp - B), (0, 0)))
    grid = (Bp // tb,)

    def batch_spec(feat):
        return pl.BlockSpec((tb, feat), lambda i: (i, 0))

    def const_spec(shape):
        nd = len(shape)
        return pl.BlockSpec(shape, lambda i, _nd=nd: (0,) * _nd)

    in_specs = [batch_spec(NSRC_PAD)] + [const_spec(w.shape) for w in packed_params]

    out = pl.pallas_call(
        _vnet_kernel,
        out_shape=jax.ShapeDtypeStruct((Bp, HIDDEN), jnp.float32),
        grid=grid,
        in_specs=in_specs,
        out_specs=batch_spec(HIDDEN),
        compiler_params=pltpu.CompilerParams(
            dimension_semantics=("parallel",)),
    )(s, *packed_params)

    return out[:B, :DATA_DIM]


# ---------------- pure-JAX reference (for correctness check) ----------------
def _ref_forward(vt, t_v, xt, t, params):
    (dt_w1, dt_b1, dt_w2, dt_b2,
     vt_w1, vt_b1, vt_w2, vt_b2,
     dm_w1, dm_b1, dm_w2, dm_b2,
     vm_w1, vm_b1, vm_w2, vm_b2,
     fc1_w, fc1_b, fc2_w, fc2_b, fc3_w, fc3_b) = params

    freqs = jnp.exp(-(LOG10000 / (HALF - 1)) * jnp.arange(HALF, dtype=jnp.float32))

    def gelu(x):
        return 0.5 * x * (1.0 + jax.lax.erf(x / jnp.sqrt(2.0)))

    def sin_emb(x):  # (...,) -> (..., DIM)
        ang = x[..., None] * freqs
        return jnp.concatenate([jnp.sin(ang), jnp.cos(ang)], axis=-1)

    def time_mlp(x_col, w1, b1, w2, b2):  # x_col (B,1)
        e = sin_emb(x_col[:, 0])
        return gelu(e @ w1 + b1) @ w2 + b2

    def data_mlp(x, w1, b1, w2, b2):  # x (B, data_dim)
        e = sin_emb(x)                      # (B, data_dim, DIM)
        h = e @ w1 + b1                     # (B, data_dim, DIM)
        h = h.reshape(x.shape[0], -1)       # Flatten
        return gelu(h) @ w2 + b2

    t_f = time_mlp(t, dt_w1, dt_b1[0], dt_w2, dt_b2[0])
    tv_f = time_mlp(t_v, vt_w1, vt_b1[0], vt_w2, vt_b2[0])
    xt_f = data_mlp(xt, dm_w1, dm_b1[0], dm_w2, dm_b2[0])
    vt_f = data_mlp(vt, vm_w1, vm_b1[0], vm_w2, vm_b2[0])
    x = jnp.concatenate([vt_f, tv_f, xt_f, t_f], axis=1)
    x = gelu(x @ fc1_w + fc1_b[0])
    x = gelu(x @ fc2_w + fc2_b[0])
    return x @ fc3_w + fc3_b[0]


def _linear_params(key, fan_in, fan_out):
    k1, k2 = jax.random.split(key)
    bound = 1.0 / math.sqrt(fan_in)
    w = jax.random.uniform(k1, (fan_in, fan_out), jnp.float32, -bound, bound)
    b = jax.random.uniform(k2, (1, fan_out), jnp.float32, -bound, bound)
    return w, b


def make_params(key):
    keys = jax.random.split(key, 11)
    params = []
    # data_time_mlp: Linear(32,32), Linear(32,32)
    params += _linear_params(keys[0], DIM, DIM) + _linear_params(keys[1], DIM, DIM)
    # v_time_mlp
    params += _linear_params(keys[2], DIM, DIM) + _linear_params(keys[3], DIM, DIM)
    # data_mlp: Linear(32,32), Linear(data_dim*32, 32)
    params += _linear_params(keys[4], DIM, DIM) + _linear_params(keys[5], DATA_DIM * DIM, DIM)
    # v_mlp
    params += _linear_params(keys[6], DIM, DIM) + _linear_params(keys[7], DATA_DIM * DIM, DIM)
    # fc1/fc2/fc3
    params += _linear_params(keys[8], 4 * DIM, HIDDEN * 2)
    params += _linear_params(keys[9], HIDDEN * 2, HIDDEN)
    params += _linear_params(keys[10], HIDDEN, DATA_DIM)
    return tuple(params)


if __name__ == "__main__":
    key = jax.random.PRNGKey(0)
    kp, kv, ktv, kx, kt = jax.random.split(key, 5)

    params = make_params(kp)
    packed = pack_params(params)

    for B in (8, 20):   # 20 exercises the batch-padding path
        kv2, ktv2, kx2, kt2 = jax.random.split(jax.random.fold_in(key, B), 4)
        vt = jax.random.normal(kv2, (B, DATA_DIM), jnp.float32)
        xt = jax.random.normal(kx2, (B, DATA_DIM), jnp.float32)
        t = jax.random.uniform(kt2, (B, 1), jnp.float32)
        t_v = jax.random.uniform(ktv2, (B, 1), jnp.float32)

        out = vnet_forward(vt, t_v, xt, t, packed)
        out = jax.block_until_ready(out)

        ref = _ref_forward(vt, t_v, xt, t, params)
        np.testing.assert_allclose(np.asarray(out), np.asarray(ref),
                                   rtol=1e-2, atol=1e-2)

    print("KERNEL_OK")
</pallas_src>

<mosaic_0001>
module attributes {stable_mosaic.version = 11 : i64} {
  func.func @_vnet_kernel(%arg0: i32, %arg1: memref<8x8xf32, #tpu.memory_space<vmem>>, %arg2: memref<8x128xf32, #tpu.memory_space<vmem>>, %arg3: memref<128x256xf32, #tpu.memory_space<vmem>>, %arg4: memref<128x256xf32, #tpu.memory_space<vmem>>, %arg5: memref<1x256xf32, #tpu.memory_space<vmem>>, %arg6: memref<256x128xf32, #tpu.memory_space<vmem>>, %arg7: memref<1x128xf32, #tpu.memory_space<vmem>>, %arg8: memref<128x256xf32, #tpu.memory_space<vmem>>, %arg9: memref<1x256xf32, #tpu.memory_space<vmem>>, %arg10: memref<256x128xf32, #tpu.memory_space<vmem>>, %arg11: memref<1x128xf32, #tpu.memory_space<vmem>>, %arg12: memref<128x128xf32, #tpu.memory_space<vmem>>, %arg13: memref<1x128xf32, #tpu.memory_space<vmem>>, %arg14: memref<8x128xf32, #tpu.memory_space<vmem>>) attributes {dimension_semantics = [#tpu.dimension_semantics<parallel>], iteration_bounds = array<i64: 1>, scalar_prefetch = 0 : i64, scratch_operands = 0 : i64, tpu.core_type = #tpu.core_type<tc>, window_params = [{transform_indices = @transform_0, window_bounds = array<i64: 8, 8>}, {pipeline_mode = #tpu.pipeline_mode<synchronous>, transform_indices = @transform_1, window_bounds = array<i64: 8, 128>}, {pipeline_mode = #tpu.pipeline_mode<synchronous>, transform_indices = @transform_2, window_bounds = array<i64: 128, 256>}, {pipeline_mode = #tpu.pipeline_mode<synchronous>, transform_indices = @transform_3, window_bounds = array<i64: 128, 256>}, {pipeline_mode = #tpu.pipeline_mode<synchronous>, transform_indices = @transform_4, window_bounds = array<i64: 1, 256>}, {pipeline_mode = #tpu.pipeline_mode<synchronous>, transform_indices = @transform_5, window_bounds = array<i64: 256, 128>}, {pipeline_mode = #tpu.pipeline_mode<synchronous>, transform_indices = @transform_6, window_bounds = array<i64: 1, 128>}, {pipeline_mode = #tpu.pipeline_mode<synchronous>, transform_indices = @transform_7, window_bounds = array<i64: 128, 256>}, {pipeline_mode = #tpu.pipeline_mode<synchronous>, transform_indices = @transform_8, window_bounds = array<i64: 1, 256>}, {pipeline_mode = #tpu.pipeline_mode<synchronous>, transform_indices = @transform_9, window_bounds = array<i64: 256, 128>}, {pipeline_mode = #tpu.pipeline_mode<synchronous>, transform_indices = @transform_10, window_bounds = array<i64: 1, 128>}, {pipeline_mode = #tpu.pipeline_mode<synchronous>, transform_indices = @transform_11, window_bounds = array<i64: 128, 128>}, {pipeline_mode = #tpu.pipeline_mode<synchronous>, transform_indices = @transform_12, window_bounds = array<i64: 1, 128>}, {transform_indices = @transform_13, window_bounds = array<i64: 8, 128>}]} {
    %c0 = arith.constant 0 : index
    %c0_0 = arith.constant 0 : index
    %0 = vector.load %arg1[%c0, %c0_0] : memref<8x8xf32, #tpu.memory_space<vmem>>, vector<8x8xf32>
    %c0_1 = arith.constant 0 : index
    %c0_2 = arith.constant 0 : index
    %1 = vector.load %arg2[%c0_1, %c0_2] : memref<8x128xf32, #tpu.memory_space<vmem>>, vector<8x128xf32>
    %cst = arith.constant dense<0.000000e+00> : vector<8x128xf32>
    %2 = tpu.matmul %0, %1, %cst {dimension_numbers = #tpu.dot_dimension_numbers<[1], [0], [0], [1], [0, 0, 1, 1], [], []>} : vector<8x8xf32>, vector<8x128xf32>, vector<8x128xf32> -> vector<8x128xf32>
    %3 = math.sin %2 : vector<8x128xf32>
    %c0_3 = arith.constant 0 : index
    %c0_4 = arith.constant 0 : index
    %4 = vector.load %arg3[%c0_3, %c0_4] : memref<128x256xf32, #tpu.memory_space<vmem>>, vector<128x256xf32>
    %cst_5 = arith.constant dense<0.000000e+00> : vector<8x256xf32>
    %5 = tpu.matmul %3, %4, %cst_5 {dimension_numbers = #tpu.dot_dimension_numbers<[1], [0], [0], [1], [0, 0, 1, 1], [], []>} : vector<8x128xf32>, vector<128x256xf32>, vector<8x256xf32> -> vector<8x256xf32>
    %6 = math.cos %2 : vector<8x128xf32>
    %c0_6 = arith.constant 0 : index
    %c0_7 = arith.constant 0 : index
    %7 = vector.load %arg4[%c0_6, %c0_7] : memref<128x256xf32, #tpu.memory_space<vmem>>, vector<128x256xf32>
    %cst_8 = arith.constant dense<0.000000e+00> : vector<8x256xf32>
    %8 = tpu.matmul %6, %7, %cst_8 {dimension_numbers = #tpu.dot_dimension_numbers<[1], [0], [0], [1], [0, 0, 1, 1], [], []>} : vector<8x128xf32>, vector<128x256xf32>, vector<8x256xf32> -> vector<8x256xf32>
    %9 = arith.addf %5, %8 : vector<8x256xf32>
    %c0_9 = arith.constant 0 : index
    %c0_10 = arith.constant 0 : index
    %10 = vector.load %arg5[%c0_9, %c0_10] : memref<1x256xf32, #tpu.memory_space<vmem>>, vector<1x256xf32>
    %11 = vector.broadcast %10 : vector<1x256xf32> to vector<8x256xf32>
    %12 = arith.addf %9, %11 : vector<8x256xf32>
    %cst_11 = arith.constant 5.000000e-01 : f32
    %13 = vector.broadcast %cst_11 : f32 to vector<8x256xf32>
    %14 = arith.mulf %13, %12 : vector<8x256xf32>
    %cst_12 = arith.constant 0.707106769 : f32
    %15 = vector.broadcast %cst_12 : f32 to vector<8x256xf32>
    %16 = arith.mulf %12, %15 : vector<8x256xf32>
    %17 = math.erf %16 : vector<8x256xf32>
    %cst_13 = arith.constant 1.000000e+00 : f32
    %18 = vector.broadcast %cst_13 : f32 to vector<8x256xf32>
    %19 = arith.addf %18, %17 : vector<8x256xf32>
    %20 = arith.mulf %14, %19 : vector<8x256xf32>
    %c0_14 = arith.constant 0 : index
    %c0_15 = arith.constant 0 : index
    %21 = vector.load %arg6[%c0_14, %c0_15] : memref<256x128xf32, #tpu.memory_space<vmem>>, vector<256x128xf32>
    %cst_16 = arith.constant dense<0.000000e+00> : vector<8x128xf32>
    %22 = tpu.matmul %20, %21, %cst_16 {dimension_numbers = #tpu.dot_dimension_numbers<[1], [0], [0], [1], [0, 0, 1, 1], [], []>} : vector<8x256xf32>, vector<256x128xf32>, vector<8x128xf32> -> vector<8x128xf32>
    %c0_17 = arith.constant 0 : index
    %c0_18 = arith.constant 0 : index
    %23 = vector.load %arg7[%c0_17, %c0_18] : memref<1x128xf32, #tpu.memory_space<vmem>>, vector<1x128xf32>
    %24 = vector.broadcast %23 : vector<1x128xf32> to vector<8x128xf32>
    %25 = arith.addf %22, %24 : vector<8x128xf32>
    %c0_19 = arith.constant 0 : index
    %c0_20 = arith.constant 0 : index
    %26 = vector.load %arg8[%c0_19, %c0_20] : memref<128x256xf32, #tpu.memory_space<vmem>>, vector<128x256xf32>
    %cst_21 = arith.constant dense<0.000000e+00> : vector<8x256xf32>
    %27 = tpu.matmul %25, %26, %cst_21 {dimension_numbers = #tpu.dot_dimension_numbers<[1], [0], [0], [1], [0, 0, 1, 1], [], []>} : vector<8x128xf32>, vector<128x256xf32>, vector<8x256xf32> -> vector<8x256xf32>
    %c0_22 = arith.constant 0 : index
    %c0_23 = arith.constant 0 : index
    %28 = vector.load %arg9[%c0_22, %c0_23] : memref<1x256xf32, #tpu.memory_space<vmem>>, vector<1x256xf32>
    %29 = vector.broadcast %28 : vector<1x256xf32> to vector<8x256xf32>
    %30 = arith.addf %27, %29 : vector<8x256xf32>
    %cst_24 = arith.constant 5.000000e-01 : f32
    %31 = vector.broadcast %cst_24 : f32 to vector<8x256xf32>
    %32 = arith.mulf %31, %30 : vector<8x256xf32>
    %cst_25 = arith.constant 0.707106769 : f32
    %33 = vector.broadcast %cst_25 : f32 to vector<8x256xf32>
    %34 = arith.mulf %30, %33 : vector<8x256xf32>
    %35 = math.erf %34 : vector<8x256xf32>
    %cst_26 = arith.constant 1.000000e+00 : f32
    %36 = vector.broadcast %cst_26 : f32 to vector<8x256xf32>
    %37 = arith.addf %36, %35 : vector<8x256xf32>
    %38 = arith.mulf %32, %37 : vector<8x256xf32>
    %c0_27 = arith.constant 0 : index
    %c0_28 = arith.constant 0 : index
    %39 = vector.load %arg10[%c0_27, %c0_28] : memref<256x128xf32, #tpu.memory_space<vmem>>, vector<256x128xf32>
    %cst_29 = arith.constant dense<0.000000e+00> : vector<8x128xf32>
    %40 = tpu.matmul %38, %39, %cst_29 {dimension_numbers = #tpu.dot_dimension_numbers<[1], [0], [0], [1], [0, 0, 1, 1], [], []>} : vector<8x256xf32>, vector<256x128xf32>, vector<8x128xf32> -> vector<8x128xf32>
    %c0_30 = arith.constant 0 : index
    %c0_31 = arith.constant 0 : index
    %41 = vector.load %arg11[%c0_30, %c0_31] : memref<1x128xf32, #tpu.memory_space<vmem>>, vector<1x128xf32>
    %42 = vector.broadcast %41 : vector<1x128xf32> to vector<8x128xf32>
    %43 = arith.addf %40, %42 : vector<8x128xf32>
    %cst_32 = arith.constant 5.000000e-01 : f32
    %44 = vector.broadcast %cst_32 : f32 to vector<8x128xf32>
    %45 = arith.mulf %44, %43 : vector<8x128xf32>
    %cst_33 = arith.constant 0.707106769 : f32
    %46 = vector.broadcast %cst_33 : f32 to vector<8x128xf32>
    %47 = arith.mulf %43, %46 : vector<8x128xf32>
    %48 = math.erf %47 : vector<8x128xf32>
    %cst_34 = arith.constant 1.000000e+00 : f32
    %49 = vector.broadcast %cst_34 : f32 to vector<8x128xf32>
    %50 = arith.addf %49, %48 : vector<8x128xf32>
    %51 = arith.mulf %45, %50 : vector<8x128xf32>
    %c0_35 = arith.constant 0 : index
    %c0_36 = arith.constant 0 : index
    %52 = vector.load %arg12[%c0_35, %c0_36] : memref<128x128xf32, #tpu.memory_space<vmem>>, vector<128x128xf32>
    %cst_37 = arith.constant dense<0.000000e+00> : vector<8x128xf32>
    %53 = tpu.matmul %51, %52, %cst_37 {dimension_numbers = #tpu.dot_dimension_numbers<[1], [0], [0], [1], [0, 0, 1, 1], [], []>} : vector<8x128xf32>, vector<128x128xf32>, vector<8x128xf32> -> vector<8x128xf32>
    %c0_38 = arith.constant 0 : index
    %c0_39 = arith.constant 0 : index
    %54 = vector.load %arg13[%c0_38, %c0_39] : memref<1x128xf32, #tpu.memory_space<vmem>>, vector<1x128xf32>
    %55 = vector.broadcast %54 : vector<1x128xf32> to vector<8x128xf32>
    %56 = arith.addf %53, %55 : vector<8x128xf32>
    %c0_40 = arith.constant 0 : index
    %c0_41 = arith.constant 0 : index
    %57 = vector.load %arg14[%c0_40, %c0_41] : memref<8x128xf32, #tpu.memory_space<vmem>>, vector<8x128xf32>
    tpu.vector_store %arg14[%c0_40, %c0_41], %56 {strides = array<i32>} : memref<8x128xf32, #tpu.memory_space<vmem>>, vector<8x128xf32>,
    return
  }
  func.func @transform_0(%arg0: i32) -> (i32, i32) {
    %c0_i32 = arith.constant 0 : i32
    %c0_i32_0 = arith.constant 0 : i32
    return %arg0, %c0_i32 : i32, i32
  }
  func.func @transform_1(%arg0: i32) -> (i32, i32) {
    %c0_i32 = arith.constant 0 : i32
    %c0_i32_0 = arith.constant 0 : i32
    %c0_i32_1 = arith.constant 0 : i32
    return %c0_i32, %c0_i32_0 : i32, i32
  }
  func.func @transform_2(%arg0: i32) -> (i32, i32) {
    %c0_i32 = arith.constant 0 : i32
    %c0_i32_0 = arith.constant 0 : i32
    %c0_i32_1 = arith.constant 0 : i32
    return %c0_i32, %c0_i32_0 : i32, i32
  }
  func.func @transform_3(%arg0: i32) -> (i32, i32) {
    %c0_i32 = arith.constant 0 : i32
    %c0_i32_0 = arith.constant 0 : i32
    %c0_i32_1 = arith.constant 0 : i32
    return %c0_i32, %c0_i32_0 : i32, i32
  }
  func.func @transform_4(%arg0: i32) -> (i32, i32) {
    %c0_i32 = arith.constant 0 : i32
    %c0_i32_0 = arith.constant 0 : i32
    %c0_i32_1 = arith.constant 0 : i32
    return %c0_i32, %c0_i32_0 : i32, i32
  }
  func.func @transform_5(%arg0: i32) -> (i32, i32) {
    %c0_i32 = arith.constant 0 : i32
    %c0_i32_0 = arith.constant 0 : i32
    %c0_i32_1 = arith.constant 0 : i32
    return %c0_i32, %c0_i32_0 : i32, i32
  }
  func.func @transform_6(%arg0: i32) -> (i32, i32) {
    %c0_i32 = arith.constant 0 : i32
    %c0_i32_0 = arith.constant 0 : i32
    %c0_i32_1 = arith.constant 0 : i32
    return %c0_i32, %c0_i32_0 : i32, i32
  }
  func.func @transform_7(%arg0: i32) -> (i32, i32) {
    %c0_i32 = arith.constant 0 : i32
    %c0_i32_0 = arith.constant 0 : i32
    %c0_i32_1 = arith.constant 0 : i32
    return %c0_i32, %c0_i32_0 : i32, i32
  }
  func.func @transform_8(%arg0: i32) -> (i32, i32) {
    %c0_i32 = arith.constant 0 : i32
    %c0_i32_0 = arith.constant 0 : i32
    %c0_i32_1 = arith.constant 0 : i32
    return %c0_i32, %c0_i32_0 : i32, i32
  }
  func.func @transform_9(%arg0: i32) -> (i32, i32) {
    %c0_i32 = arith.constant 0 : i32
    %c0_i32_0 = arith.constant 0 : i32
    %c0_i32_1 = arith.constant 0 : i32
    return %c0_i32, %c0_i32_0 : i32, i32
  }
  func.func @transform_10(%arg0: i32) -> (i32, i32) {
    %c0_i32 = arith.constant 0 : i32
    %c0_i32_0 = arith.constant 0 : i32
    %c0_i32_1 = arith.constant 0 : i32
    return %c0_i32, %c0_i32_0 : i32, i32
  }
  func.func @transform_11(%arg0: i32) -> (i32, i32) {
    %c0_i32 = arith.constant 0 : i32
    %c0_i32_0 = arith.constant 0 : i32
    %c0_i32_1 = arith.constant 0 : i32
    return %c0_i32, %c0_i32_0 : i32, i32
  }
  func.func @transform_12(%arg0: i32) -> (i32, i32) {
    %c0_i32 = arith.constant 0 : i32
    %c0_i32_0 = arith.constant 0 : i32
    %c0_i32_1 = arith.constant 0 : i32
    return %c0_i32, %c0_i32_0 : i32, i32
  }
  func.func @transform_13(%arg0: i32) -> (i32, i32) {
    %c0_i32 = arith.constant 0 : i32
    %c0_i32_0 = arith.constant 0 : i32
    return %arg0, %c0_i32 : i32, i32
  }
}

</mosaic_0001>

<bundles_post_ra>
// kernel: tpu_custom_call.1
= control target key start
LH: loop header
LB: loop body
LE: loop exit
PB: predicated region body
PF: predicated region fallthrough
CT: control target
= control target key end

     0   :  { %18 = vsyncpa [#allocation3], 0  ;;  %s1695_s0 = inlined_call_operand.hbm [shape: f32[8,8], index: 0, kind: input, shape index: {}]   ;;  %s1696_s1 = inlined_call_operand.hbm [shape: f32[8,128], index: 1, kind: input, shape index: {}]   ;;  %s1697_s2 = inlined_call_operand.hbm [shape: f32[128,256], index: 2, kind: input, shape index: {}]   ;;  %s1698_s3 = inlined_call_operand.hbm [shape: f32[128,256], index: 3, kind: input, shape index: {}]   ;;  %s1699_s4 = inlined_call_operand.vmem [shape: f32[1,256], index: 4, kind: input, shape index: {}]   ;;  %s1700_s5 = inlined_call_operand.hbm [shape: f32[256,128], index: 5, kind: input, shape index: {}]   ;;  %s1701_s6 = inlined_call_operand.vmem [shape: f32[1,128], index: 6, kind: input, shape index: {}]   ;;  %s1702_s7 = inlined_call_operand.hbm [shape: f32[128,256], index: 7, kind: input, shape index: {}]   ;;  %s1703_s8 = inlined_call_operand.vmem [shape: f32[1,256], index: 8, kind: input, shape index: {}]   ;;  %s1704_s9 = inlined_call_operand.hbm [shape: f32[256,128], index: 9, kind: input, shape index: {}]   ;;  %s1705_s10 = inlined_call_operand.vmem [shape: f32[1,128], index: 10, kind: input, shape index: {}]   ;;  %s1706_s11 = inlined_call_operand.hbm [shape: f32[128,128], index: 11, kind: input, shape index: {}]   ;;  %s1707_s12 = inlined_call_operand.vmem [shape: f32[1,128], index: 12, kind: input, shape index: {}]   ;;  %s1708_s13 = inlined_call_operand.hbm [shape: f32[8,128], index: 13, kind: output, shape index: {}]  }
   0x1   :  { %19 = vsyncpa [#allocation6], 0 }
   0x2   :  { %20 = vsyncpa [#allocation9], 0 }
   0x3   :  { %21 = vsyncpa [#allocation12], 0 }
   0x4   :  { %22 = vsyncpa [#allocation15], 0 }
   0x5   :  { %23 = vsyncpa [#allocation4], 0  ;;  %s1496_s25 = smov [#allocation5]  }
   0x6   :  { %s40_s26 = sshll.u32 %s1496_s25, 4  ;;  %s41_s26 = int_to_ptr.vmem [resolvable:$true] %s40_s26 }
   0x7   :  { %s1312_s27 = scalar_lea.vmem %s41_s26, 128  ;;  %p1317_p1 = scmp.lt.s32.totalorder %s41_s26, %s41_s26 }
   0x8   :  { %p1313_p0 = scmp.ne.s32.totalorder %s41_s26, %s1312_s27  ;;  %p1318_p2 = scmp.lt.s32.totalorder %s1312_s27, %s1312_s27 }
   0xa   :  { %p1319_p3 = por %p1318_p2, %p1317_p1 }
   0xc   :  { %p1320_p4 = pnand %p1319_p3, %p1313_p0 }
   0xe   :  { %1323 = shalt.err (!%p1320_p4)
}
   0xf   :  { %43 = dma.hbm_to_vmem [thread:$0]  %s1696_s1, 128, %s41_s26, [#allocation6]  }
  0x10   :  { %s1497_s30 = smov [#allocation8]   ;;  %s1498_s15 = smov [#allocation11]  }
  0x11   :  { %s61_s14 = sshll.u32 %s1497_s30, 4  ;;  %s89_s16 = sshll.u32 %s1498_s15, 4  ;;  %s62_s14 = int_to_ptr.vmem [resolvable:$true] %s61_s14  ;;  %s90_s16 = int_to_ptr.vmem [resolvable:$true] %s89_s16 }
  0x12   :  { %s1332_s17 = scalar_lea.vmem %s62_s14, 4096  ;;  %p1337_p6 = scmp.lt.s32.totalorder %s62_s14, %s62_s14 }
  0x13   :  { %p1333_p5 = scmp.ne.s32.totalorder %s62_s14, %s1332_s17  ;;  %p1338_p7 = scmp.lt.s32.totalorder %s1332_s17, %s1332_s17 }
  0x15   :  { %p1339_p8 = por %p1338_p7, %p1337_p6 }
  0x17   :  { %p1340_p9 = pnand %p1339_p8, %p1333_p5 }
  0x19   :  { %1343 = shalt.err (!%p1340_p9)
}
  0x1a   :  { %s1499_s18 = smov 256   ;;  %s1500_s19 = smov 16  }
  0x1b   :  { %67 = dma.hbm_to_vmem [thread:$0]  %s1698_s3, 4096, %s62_s14, [#allocation9], %s1499_s18, %s1499_s18, %s1500_s19  }
  0x1c   :  { %s1352_s1 = scalar_lea.vmem %s90_s16, 4096  ;;  %p1357_p11 = scmp.lt.s32.totalorder %s90_s16, %s90_s16 }
  0x1d   :  { %p1353_p10 = scmp.ne.s32.totalorder %s90_s16, %s1352_s1  ;;  %p1358_p12 = scmp.lt.s32.totalorder %s1352_s1, %s1352_s1 }
  0x1f   :  { %p1359_p13 = por %p1358_p12, %p1357_p11 }
  0x21   :  { %p1360_p0 = pnand %p1359_p13, %p1353_p10 }
  0x23   :  { %1363 = shalt.err (!%p1360_p0)
}
  0x24   :  { %95 = dma.hbm_to_vmem [thread:$0]  %s1702_s7, 4096, %s90_s16, [#allocation12], %s1499_s18, %s1499_s18, %s1500_s19  }
  0x25   :  { %s1501_s24 = smov [#allocation2]   ;;  %s1502_s26 = smov [#allocation7]  }
  0x26   :  { %s30_s25 = sshll.u32 %s1501_s24, 4  ;;  %s49_s3 = sshll.u32 %s1502_s26, 4  ;;  %s31_s25 = int_to_ptr.vmem [resolvable:$true] %s30_s25  ;;  %s50_s3 = int_to_ptr.vmem [resolvable:$true] %s49_s3 }
  0x27   :  { %s1372_s27 = scalar_lea.vmem %s31_s25, 128  ;;  %p1377_p2 = scmp.lt.s32.totalorder %s31_s25, %s31_s25 }
  0x28   :  { %p1373_p1 = scmp.ne.s32.totalorder %s31_s25, %s1372_s27  ;;  %p1378_p3 = scmp.lt.s32.totalorder %s1372_s27, %s1372_s27 }
  0x2a   :  { %p1379_p4 = por %p1378_p3, %p1377_p2 }
  0x2c   :  { %p1380_p5 = pnand %p1379_p4, %p1373_p1 }
  0x2e   :  { %1383 = shalt.err (!%p1380_p5)
}
  0x2f   :  { %33 = dma.hbm_to_vmem [thread:$0]  %s1695_s0, 128, %s31_s25, [#allocation3]  }
  0x30   :  { %s1392_s30 = scalar_lea.vmem %s50_s3, 4096  ;;  %p1397_p7 = scmp.lt.s32.totalorder %s50_s3, %s50_s3 }
  0x31   :  { %p1393_p6 = scmp.ne.s32.totalorder %s50_s3, %s1392_s30  ;;  %p1398_p8 = scmp.lt.s32.totalorder %s1392_s30, %s1392_s30 }
  0x33   :  { %p1399_p9 = por %p1398_p8, %p1397_p7 }
  0x35   :  { %p1400_p10 = pnand %p1399_p9, %p1393_p6 }
  0x37   :  { %1403 = shalt.err (!%p1400_p10)
}
  0x38   :  { %55 = dma.hbm_to_vmem [thread:$0]  %s1697_s2, 4096, %s50_s3, [#allocation6], %s1499_s18, %s1499_s18, %s1500_s19  }
  0x39   :  { %s1503_s15 = smov [#allocation10]  }
  0x3a   :  { %s75_s16 = sshll.u32 %s1503_s15, 4  ;;  %s76_s16 = int_to_ptr.vmem [resolvable:$true] %s75_s16 }
  0x3b   :  { %s1412_s17 = scalar_lea.vmem %s76_s16, 4096  ;;  %p1417_p12 = scmp.lt.s32.totalorder %s76_s16, %s76_s16 }
  0x3c   :  { %p1413_p11 = scmp.ne.s32.totalorder %s76_s16, %s1412_s17  ;;  %p1418_p13 = scmp.lt.s32.totalorder %s1412_s17, %s1412_s17 }
  0x3e   :  { %p1419_p0 = por %p1418_p13, %p1417_p12 }
  0x40   :  { %p1420_p1 = pnand %p1419_p0, %p1413_p11 }
  0x42   :  { %1423 = shalt.err (!%p1420_p1)
}
  0x43   :  { %s1504_s0 = smov 128   ;;  %s1505_s20 = smov 8  }
  0x44   :  { %81 = dma.hbm_to_vmem [thread:$0]  %s1700_s5, 4096, %s76_s16, [#allocation9], %s1504_s0, %s1504_s0, %s1505_s20  }
  0x45   :  { %s1506_s22 = smov [#allocation13]   ;;  %s1507_s24 = smov [#allocation14]  }
  0x46   :  { %s103_s23 = sshll.u32 %s1506_s22, 4  ;;  %s117_s2 = sshll.u32 %s1507_s24, 4  ;;  %s104_s23 = int_to_ptr.vmem [resolvable:$true] %s103_s23  ;;  %s118_s2 = int_to_ptr.vmem [resolvable:$true] %s117_s2 }
  0x47   :  { %s1432_s18 = scalar_lea.vmem %s104_s23, 4096  ;;  %p1437_p3 = scmp.lt.s32.totalorder %s104_s23, %s104_s23 }
  0x48   :  { %p1433_p2 = scmp.ne.s32.totalorder %s104_s23, %s1432_s18  ;;  %p1438_p4 = scmp.lt.s32.totalorder %s1432_s18, %s1432_s18 }
  0x4a   :  { %p1439_p5 = por %p1438_p4, %p1437_p3 }
  0x4c   :  { %p1440_p6 = pnand %p1439_p5, %p1433_p2 }
  0x4e   :  { %1443 = shalt.err (!%p1440_p6)
}
  0x4f   :  { %109 = dma.hbm_to_vmem [thread:$0]  %s1704_s9, 4096, %s104_s23, [#allocation12], %s1504_s0, %s1504_s0, %s1505_s20  }
  0x50   :  { %s1452_s26 = scalar_lea.vmem %s118_s2, 2048  ;;  %p1457_p8 = scmp.lt.s32.totalorder %s118_s2, %s118_s2 }
  0x51   :  { %p1453_p7 = scmp.ne.s32.totalorder %s118_s2, %s1452_s26  ;;  %p1458_p9 = scmp.lt.s32.totalorder %s1452_s26, %s1452_s26 }
  0x53   :  { %p1459_p10 = por %p1458_p9, %p1457_p8 }
  0x55   :  { %p1460_p11 = pnand %p1459_p10, %p1453_p7 }
  0x57   :  { %1463 = shalt.err (!%p1460_p11)
}
  0x58   :  { %123 = dma.hbm_to_vmem [thread:$0]  %s1706_s11, 2048, %s118_s2, [#allocation15], %s1504_s0, %s1504_s0, %s1505_s20  }
  0x59   :  { %1484 = dma.done.wait [#allocation3], 128  }
  0x5a   :  { %1485 = vsyncadd [#allocation3], 4294967168 }
  0x5b   :  { %1486 = dma.done.wait [#allocation6], 4224  }
  0x5c   :  { %1487 = vsyncadd [#allocation6], 4294963072 }
  0x5d   :  { %1488 = dma.done.wait [#allocation9], 8192  }
  0x5e   :  { %1489 = vsyncadd [#allocation9], 4294959104 }
  0x5f   :  { %1490 = dma.done.wait [#allocation12], 8192  }
  0x60   :  { %1491 = vsyncadd [#allocation12], 4294959104 }
  0x61   :  { %1492 = dma.done.wait [#allocation15], 2048  }
  0x62   :  { %1493 = vsyncadd [#allocation15], 4294965248  ;;  %v1508_v0 = vmov 0.0   ;;  %vm1509_vm0 = vmmov 0   ;;  %vm152_vm1 = vcmask 64512   ;;  %v151_v1 = vld [vmem:[#allocation5] sm:$0xff] }
  0x63   :  { %1225 = vmatprep.subr.mxu0 %v1508_v0  ;;  %1227 = vmatprep.mubr.msk.f32.mxu0 %vm1509_vm0, %v1508_v0  ;;  %v150_v2 = vld [vmem:[#allocation2] sm:$0xff]  ;;  %v496_v3 = vld [vmem:[#allocation8 + $0xf8] sm:$0xff]  ;;  %v494_v7 = vld [vmem:[#allocation8 + $0xe8] sm:$0xff]  ;;  %s1516_s14 = smov [#allocation16]  }
  0x64   :  { %561 = vmatprep.mubr.f32.mxu1 %v1508_v0  ;;  %1226 = vmatpush3.msra.mxu0 %v151_v1  ;;  %v361_v4 = vld [vmem:[#allocation7 + $0xf8] sm:$0xff]  ;;  %v495_v5 = vld [vmem:[#allocation8 + $0xf0] sm:$0xff]  ;;  %v359_v8 = vld [vmem:[#allocation7 + $0xe8] sm:$0xff]  ;;  %s1111_s15 = sshll.u32 %s1516_s14, 4  ;;  %s1112_s15 = int_to_ptr.vmem [resolvable:$true] %s1111_s15 }
  0x65   :  { %1228 = vmatmul.mubr.msk.f32.vlgmr.msra.gmra.mxu0 %vm152_vm1, %v150_v2  ;;  %497 = vmatprep.subr.mxu1 %v496_v3  ;;  %v360_v6 = vld [vmem:[#allocation7 + $0xf0] sm:$0xff]  ;;  %v493_v9 = vld [vmem:[#allocation8 + $0xe0] sm:$0xff]  ;;  %v492_v11 = vld [vmem:[#allocation8 + $0xd8] sm:$0xff]  ;;  %p1469_p13 = scmp.lt.s32.totalorder %s1112_s15, %s1112_s15 }
  0x66   :  { %632 = vmatprep.mubr.f32.mxu0 %v1508_v0  ;;  %568 = vmatprep.subr.mxu0 %v361_v4  ;;  %v358_v10 = vld [vmem:[#allocation7 + $0xe0] sm:$0xff]  ;;  %v357_v12 = vld [vmem:[#allocation7 + $0xd8] sm:$0xff]  ;;  %v491_v13 = vld [vmem:[#allocation8 + $0xd0] sm:$0xff] }
  0x67   :  { %498 = vmatpush1.msra.mxu1 %v495_v5  ;;  %569 = vmatpush1.msra.mxu0 %v360_v6  ;;  %v356_v14 = vld [vmem:[#allocation7 + $0xd0] sm:$0xff]  ;;  %v490_v15 = vld [vmem:[#allocation8 + $0xc8] sm:$0xff]  ;;  %v489_v17 = vld [vmem:[#allocation8 + $0xc0] sm:$0xff] }
  0x68   :  { %499 = vmatprep.subr.mxu1 %v494_v7  ;;  %570 = vmatprep.subr.mxu0 %v359_v8  ;;  %v355_v16 = vld [vmem:[#allocation7 + $0xc8] sm:$0xff]  ;;  %v354_v18 = vld [vmem:[#allocation7 + $0xc0] sm:$0xff]  ;;  %v488_v19 = vld [vmem:[#allocation8 + $0xb8] sm:$0xff] }
  0x69   :  { %500 = vmatpush1.msra.mxu1 %v493_v9  ;;  %571 = vmatpush1.msra.mxu0 %v358_v10  ;;  %v353_v20 = vld [vmem:[#allocation7 + $0xb8] sm:$0xff]  ;;  %v487_v21 = vld [vmem:[#allocation8 + $0xb0] sm:$0xff]  ;;  %v486_v23 = vld [vmem:[#allocation8 + $0xa8] sm:$0xff] }
  0x6a   :  { %501 = vmatprep.subr.mxu1 %v492_v11  ;;  %572 = vmatprep.subr.mxu0 %v357_v12  ;;  %v352_v22 = vld [vmem:[#allocation7 + $0xb0] sm:$0xff]  ;;  %v351_v24 = vld [vmem:[#allocation7 + $0xa8] sm:$0xff]  ;;  %v485_v25 = vld [vmem:[#allocation8 + $0xa0] sm:$0xff] }
  0x6b   :  { %502 = vmatpush1.msra.mxu1 %v491_v13  ;;  %573 = vmatpush1.msra.mxu0 %v356_v14  ;;  %v350_v26 = vld [vmem:[#allocation7 + $0xa0] sm:$0xff]  ;;  %v484_v27 = vld [vmem:[#allocation8 + $0x98] sm:$0xff]  ;;  %v483_v29 = vld [vmem:[#allocation8 + $0x90] sm:$0xff] }
  0x6c   :  { %503 = vmatprep.subr.mxu1 %v490_v15  ;;  %574 = vmatprep.subr.mxu0 %v355_v16  ;;  %v349_v28 = vld [vmem:[#allocation7 + $0x98] sm:$0xff]  ;;  %v348_v30 = vld [vmem:[#allocation7 + $0x90] sm:$0xff]  ;;  %v482_v31 = vld [vmem:[#allocation8 + $0x88] sm:$0xff] }
  0x6d   :  { %504 = vmatpush1.msra.mxu1 %v489_v17  ;;  %575 = vmatpush1.msra.mxu0 %v354_v18  ;;  %v347_v32 = vld [vmem:[#allocation7 + $0x88] sm:$0xff]  ;;  %v481_v33 = vld [vmem:[#allocation8 + $0x80] sm:$0xff]  ;;  %v480_v35 = vld [vmem:[#allocation8 + $0x78] sm:$0xff]  ;;  %v1510_v17 = vmov 683565275  }
  0x6e   :  { %505 = vmatprep.subr.mxu1 %v488_v19  ;;  %576 = vmatprep.subr.mxu0 %v353_v20  ;;  %v346_v34 = vld [vmem:[#allocation7 + $0x80] sm:$0xff]  ;;  %v345_v36 = vld [vmem:[#allocation7 + $0x78] sm:$0xff]  ;;  %v479_v37 = vld [vmem:[#allocation8 + $0x70] sm:$0xff]  ;;  %v1511_v19 = vmov 2475754826  }
  0x6f   :  { %506 = vmatpush1.msra.mxu1 %v487_v21  ;;  %577 = vmatpush1.msra.mxu0 %v352_v22  ;;  %v344_v38 = vld [vmem:[#allocation7 + $0x70] sm:$0xff]  ;;  %v478_v39 = vld [vmem:[#allocation8 + $0x68] sm:$0xff]  ;;  %v477_v41 = vld [vmem:[#allocation8 + $0x60] sm:$0xff]  ;;  %v1512_v22 = vmov 2131351028  }
  0x70   :  { %507 = vmatprep.subr.mxu1 %v486_v23  ;;  %578 = vmatprep.subr.mxu0 %v351_v24  ;;  %v343_v40 = vld [vmem:[#allocation7 + $0x68] sm:$0xff]  ;;  %v342_v42 = vld [vmem:[#allocation7 + $0x60] sm:$0xff]  ;;  %v476_v43 = vld [vmem:[#allocation8 + $0x58] sm:$0xff] }
  0x71   :  { %508 = vmatpush1.msra.mxu1 %v485_v25  ;;  %579 = vmatpush1.msra.mxu0 %v350_v26  ;;  %v341_v44 = vld [vmem:[#allocation7 + $0x58] sm:$0xff]  ;;  %v475_v45 = vld [vmem:[#allocation8 + $0x50] sm:$0xff]  ;;  %v474_v47 = vld [vmem:[#allocation8 + $0x48] sm:$0xff]  ;;  %v1513_v25 = vmov 2102212464  }
  0x72   :  { %509 = vmatprep.subr.mxu1 %v484_v27  ;;  %580 = vmatprep.subr.mxu0 %v349_v28  ;;  %v340_v46 = vld [vmem:[#allocation7 + $0x50] sm:$0xff]  ;;  %v339_v48 = vld [vmem:[#allocation7 + $0x48] sm:$0xff]  ;;  %v473_v49 = vld [vmem:[#allocation8 + $0x40] sm:$0xff]  ;;  %v1514_v28 = vmov 920167782  }
  0x73   :  { %510 = vmatpush1.msra.mxu1 %v483_v29  ;;  %581 = vmatpush1.msra.mxu0 %v348_v30  ;;  %v338_v50 = vld [vmem:[#allocation7 + $0x40] sm:$0xff]  ;;  %v472_v51 = vld [vmem:[#allocation8 + $0x38] sm:$0xff]  ;;  %v471_v53 = vld [vmem:[#allocation8 + $0x30] sm:$0xff] }
  0x74   :  { %511 = vmatprep.subr.mxu1 %v482_v31  ;;  %582 = vmatprep.subr.mxu0 %v347_v32  ;;  %v337_v52 = vld [vmem:[#allocation7 + $0x38] sm:$0xff]  ;;  %v336_v54 = vld [vmem:[#allocation7 + $0x30] sm:$0xff]  ;;  %v470_v55 = vld [vmem:[#allocation8 + $0x28] sm:$0xff]  ;;  %v1515_v31 = vmov 1326507024  }
  0x75   :  { %512 = vmatpush1.msra.mxu1 %v481_v33  ;;  %583 = vmatpush1.msra.mxu0 %v346_v34  ;;  %v335_v56 = vld [vmem:[#allocation7 + $0x28] sm:$0xff]  ;;  %v469_v57 = vld [vmem:[#allocation8 + $0x20] sm:$0xff]  ;;  %v468_v59 = vld [vmem:[#allocation8 + $0x18] sm:$0xff] }
  0x76   :  { %513 = vmatprep.subr.mxu1 %v480_v35  ;;  %584 = vmatprep.subr.mxu0 %v345_v36  ;;  %v334_v58 = vld [vmem:[#allocation7 + $0x20] sm:$0xff]  ;;  %v333_v60 = vld [vmem:[#allocation7 + $0x18] sm:$0xff]  ;;  %v467_v61 = vld [vmem:[#allocation8 + $0x10] sm:$0xff] }
  0x77   :  { %514 = vmatpush1.msra.mxu1 %v479_v37  ;;  %585 = vmatpush1.msra.mxu0 %v344_v38  ;;  %v332_v62 = vld [vmem:[#allocation7 + $0x10] sm:$0xff]  ;;  %v466_v63 = vld [vmem:[#allocation8 + $0x8] sm:$0xff]  ;;  %v465_v2 = vld [vmem:[#allocation8] sm:$0xff] }
  0x78   :  { %515 = vmatprep.subr.mxu1 %v478_v39  ;;  %586 = vmatprep.subr.mxu0 %v343_v40  ;;  %v331_v1 = vld [vmem:[#allocation7 + $0x8] sm:$0xff]  ;;  %v330_v3 = vld [vmem:[#allocation7] sm:$0xff]  ;;  %v694_v4 = vld [vmem:[#allocation10 + $0xf8] sm:$0xff] }
  0x79   :  { %516 = vmatpush1.msra.mxu1 %v477_v41  ;;  %587 = vmatpush1.msra.mxu0 %v342_v42 }
  0x7a   :  { %517 = vmatprep.subr.mxu1 %v476_v43  ;;  %588 = vmatprep.subr.mxu0 %v341_v44 }
  0x7b   :  { %518 = vmatpush1.msra.mxu1 %v475_v45  ;;  %589 = vmatpush1.msra.mxu0 %v340_v46 }
  0x7c   :  { %519 = vmatprep.subr.mxu1 %v474_v47  ;;  %590 = vmatprep.subr.mxu0 %v339_v48 }
  0x7d   :  { %520 = vmatpush1.msra.mxu1 %v473_v49  ;;  %591 = vmatpush1.msra.mxu0 %v338_v50 }
  0x7e   :  { %521 = vmatprep.subr.mxu1 %v472_v51  ;;  %592 = vmatprep.subr.mxu0 %v337_v52 }
  0x7f   :  { %522 = vmatpush1.msra.mxu1 %v471_v53  ;;  %593 = vmatpush1.msra.mxu0 %v336_v54 }
  0x80   :  { %523 = vmatprep.subr.mxu1 %v470_v55  ;;  %594 = vmatprep.subr.mxu0 %v335_v56 }
  0x81   :  { %524 = vmatpush1.msra.mxu1 %v469_v57  ;;  %595 = vmatpush1.msra.mxu0 %v334_v58 }
  0x82   :  { %525 = vmatprep.subr.mxu1 %v468_v59  ;;  %596 = vmatprep.subr.mxu0 %v333_v60 }
  0x83   :  { %526 = vmatpush1.msra.mxu1 %v467_v61  ;;  %597 = vmatpush1.msra.mxu0 %v332_v62 }
  0x84   :  { %527 = vmatprep.subr.mxu1 %v466_v63  ;;  %598 = vmatprep.subr.mxu0 %v331_v1 }
  0x85   :  { %528 = vmatpush1.msra.mxu1 %v465_v2  ;;  %599 = vmatpush1.msra.mxu0 %v330_v3 }
  0x86   :  { %1138 = vmatprep.subr.mxu1 %v694_v4 }
 0x125   :  { %v1625_v5 = vpop.f32.mrf.mxu0 }
 0x126   :  { %v229_v6 = vand.u32 2139095040, %v1625_v5  ;;  %v226_v11 = vand.u32 2147483647, %v1625_v5  ;;  %vm228_vm9 = vcmp.lt.s32.totalorder %v1625_v5, 0 }
 0x127   :  { %v1229_v7 = vpop.f32.mrf.mxu0 }
 0x128   :  { %v230_v8 = vshrl.u32 %v229_v6, 23  ;;  %v233_v14 = vand.u32 8388607, %v226_v11  ;;  %vm227_vm10 = vcmp.le.f32.partialorder %v226_v11, 0.7853982 }
 0x12a   :  { %v1125_v9 = vadd.s32 4294967169, %v230_v8  ;;  %v234_v33 = vor.u32 8388608, %v233_v14 }
 0x12c   :  { %v236_v10 = vadd.s32 1, %v1125_v9  ;;  %v274_v47 = vshll.u32 %v234_v33, 8 }
 0x12e   :  { %vm237_vm2 = vcmp.gt.s32.totalorder %v236_v10, 0 }
 0x12f   :  { %v238_v12 = vsel %vm237_vm2, %v236_v10, 0  ;;  %vm318_vm2 = vweird.f32 %v1625_v5 }
 0x130   :  { %v240_v13 = vand.u32 31, %v238_v12  ;;  %v239_v16 = vshrl.u32 %v238_v12, 5 }
 0x132   :  { %v241_v15 = vsub.s32 32, %v240_v13  ;;  %v243_v18 = vshll.u32 %v1510_v17, %v240_v13  ;;  %v246_v20 = vshll.u32 %v1511_v19, %v240_v13  ;;  %v249_v24 = vshll.u32 %v1512_v22, %v240_v13 }
 0x133   :  { %v252_v27 = vshll.u32 %v1513_v25, %v240_v13  ;;  %v255_v30 = vshll.u32 %v1514_v28, %v240_v13  ;;  %vm258_vm3 = vcmp.lt.s32.totalorder %v239_v16, 1  ;;  %vm261_vm4 = vcmp.lt.s32.totalorder %v239_v16, 4 }
 0x134   :  { %v244_v21 = vshrl.u32 %v1511_v19, %v241_v15  ;;  %v247_v23 = vshrl.u32 %v1512_v22, %v241_v15  ;;  %v250_v26 = vshrl.u32 %v1513_v25, %v241_v15  ;;  %v253_v29 = vshrl.u32 %v1514_v28, %v241_v15 }
 0x135   :  { %v256_v32 = vshrl.u32 %v1515_v31, %v241_v15  ;;  %v242_v42 = vshrl.u32 %v1510_v17, %v241_v15  ;;  %vm260_vm5 = vcmp.lt.s32.totalorder %v239_v16, 3  ;;  %vm259_vm6 = vcmp.lt.s32.totalorder %v239_v16, 2 }
 0x136   :  { %v245_v34 = vor.u32 %v244_v21, %v243_v18  ;;  %v248_v35 = vor.u32 %v247_v23, %v246_v20  ;;  %v251_v36 = vor.u32 %v250_v26, %v249_v24  ;;  %v254_v37 = vor.u32 %v253_v29, %v252_v27 }
 0x137   :  { %v257_v38 = vor.u32 %v256_v32, %v255_v30 }
 0x138   :  { %v263_v39 = vsel %vm261_vm4, %v251_v36, 2102212464  ;;  %v266_v40 = vsel %vm258_vm3, %v245_v34, %v248_v35  ;;  %v270_v41 = vsel %vm258_vm3, %v248_v35, %v251_v36  ;;  %v267_v43 = vsel %vm261_vm4, %v254_v37, 920167782 }
 0x139   :  { %v271_v44 = vsel %vm261_vm4, %v257_v38, 1326507024  ;;  %v268_v45 = vsel %vm260_vm5, %v251_v36, %v267_v43  ;;  %v262_v48 = vsel %vm258_vm3, %v242_v42, %v245_v34  ;;  %v264_v49 = vsel %vm260_vm5, %v248_v35, %v263_v39  ;;  %v678_v39 = vld [vmem:[#allocation10 + $0x78] sm:$0xff]  ;;  %v693_v42 = vld [vmem:[#allocation10 + $0xf0] sm:$0xff] }
 0x13a   :  { %v272_v46 = vsel %vm260_vm5, %v254_v37, %v271_v44  ;;  %v269_v50 = vsel %vm259_vm6, %v266_v40, %v268_v45  ;;  %v265_v56 = vsel %vm259_vm6, %v262_v48, %v264_v49  ;;  %v677_v43 = vld [vmem:[#allocation10 + $0x70] sm:$0xff]  ;;  %v692_v44 = vld [vmem:[#allocation10 + $0xe8] sm:$0xff]  ;;  %v674_v48 = vld [vmem:[#allocation10 + $0x58] sm:$0xff] }
 0x13b   :  { %v273_v51 = vsel %vm259_vm6, %v270_v41, %v272_v46  ;;  %v1634_v54 = vmul.u32.u64.low %v274_v47, %v269_v50  ;;  %v1635_v55 = vmul.u32.u64.high %v274_v47, %v269_v50, %v1634_v54  ;;  %v281_v58 = vmul.u32 %v274_v47, %v265_v56  ;;  %v676_v45 = vld [vmem:[#allocation10 + $0x68] sm:$0xff]  ;;  %v691_v46 = vld [vmem:[#allocation10 + $0xe0] sm:$0xff]  ;;  %v689_v49 = vld [vmem:[#allocation10 + $0xd0] sm:$0xff] }
 0x13c   :  { %v1631_v52 = vmul.u32.u64.low %v274_v47, %v273_v51  ;;  %v1632_v53 = vmul.u32.u64.high %v274_v47, %v273_v51, %v1631_v52  ;;  %v690_v47 = vld [vmem:[#allocation10 + $0xd8] sm:$0xff]  ;;  %v673_v50 = vld [vmem:[#allocation10 + $0x50] sm:$0xff]  ;;  %v688_v51 = vld [vmem:[#allocation10 + $0xc8] sm:$0xff] }
 0x13d   :  { %v284_v57 = vadd.s32 1, %v1635_v55  ;;  %v672_v52 = vld [vmem:[#allocation10 + $0x48] sm:$0xff]  ;;  %v670_v56 = vld [vmem:[#allocation10 + $0x38] sm:$0xff] }
 0x13e   :  { %vm283_vm7 = vc.u32 %v1632_v53, %v1634_v54  ;;  %v282_v8 = vadd.s32 %v1634_v54, %v1632_v53  ;;  %v687_v53 = vld [vmem:[#allocation10 + $0xc0] sm:$0xff] }
 0x13f   :  { %v285_v59 = vsel %vm283_vm7, %v284_v57, %v1635_v55  ;;  %v671_v54 = vld [vmem:[#allocation10 + $0x40] sm:$0xff]  ;;  %v686_v55 = vld [vmem:[#allocation10 + $0xb8] sm:$0xff]  ;;  %v685_v57 = vld [vmem:[#allocation10 + $0xb0] sm:$0xff] }
 0x140   :  { %v286_v60 = vadd.s32 %v285_v59, %v281_v58  ;;  %v669_v58 = vld [vmem:[#allocation10 + $0x30] sm:$0xff]  ;;  %v684_v59 = vld [vmem:[#allocation10 + $0xa8] sm:$0xff] }
 0x142   :  { %v287_v61 = vadd.s32 536870912, %v286_v60 }
 0x144   :  { %v288_v62 = vshrl.u32 %v287_v61, 30  ;;  %v683_v61 = vld [vmem:[#allocation10 + $0xa0] sm:$0xff] }
 0x146   :  { %v289_v63 = vshll.u32 %v288_v62, 30  ;;  %v312_v22 = vsub.s32 4, %v288_v62 }
 0x148   :  { %v290_v1 = vsub.s32 %v286_v60, %v289_v63  ;;  %v313_v25 = vsel %vm228_vm9, %v312_v22, %v288_v62  ;;  %v668_v60 = vld [vmem:[#allocation10 + $0x28] sm:$0xff]  ;;  %v667_v62 = vld [vmem:[#allocation10 + $0x20] sm:$0xff]  ;;  %v682_v63 = vld [vmem:[#allocation10 + $0x98] sm:$0xff] }
 0x149   :  { %v315_v26 = vsel %vm227_vm10, 0, %v313_v25  ;;  %v791_v22 = vld [vmem:[#allocation11 + $0x98] sm:$0xff]  ;;  %v788_v25 = vld [vmem:[#allocation11 + $0x80] sm:$0xff] }
 0x14a   :  { %v292_v2 = vsub.s32 0, %v290_v1  ;;  %v319_v27 = vadd.s32 3, %v315_v26  ;;  %v455_v28 = vand.u32 3, %v315_v26  ;;  %v787_v26 = vld [vmem:[#allocation11 + $0x78] sm:$0xff] }
 0x14c   :  { %v1126_v3 = vmin.u32 %v292_v2, %v290_v1  ;;  %v320_v29 = vand.u32 3, %v319_v27  ;;  %vm460_vm11 = vcmp.eq.s32.totalorder %v455_v28, 2  ;;  %vm457_vm13 = vcmp.eq.s32.totalorder %v455_v28, 0  ;;  %v681_v2 = vld [vmem:[#allocation10 + $0x90] sm:$0xff] }
 0x14d   :  { %vm456_vm15 = vcmp.lt.s32.totalorder %v455_v28, 2  ;;  %v786_v27 = vld [vmem:[#allocation11 + $0x70] sm:$0xff]  ;;  %v785_v28 = vld [vmem:[#allocation11 + $0x68] sm:$0xff] }
 0x14e   :  { %v294_v4 = vclz %v1126_v3  ;;  %vm325_vm12 = vcmp.eq.s32.totalorder %v320_v29, 2  ;;  %vm322_vm14 = vcmp.eq.s32.totalorder %v320_v29, 0  ;;  %vm321_vm1 = vcmp.lt.s32.totalorder %v320_v29, 2  ;;  %v665_v3 = vld [vmem:[#allocation10 + $0x10] sm:$0xff]  ;;  %v784_v29 = vld [vmem:[#allocation11 + $0x60] sm:$0xff] }
 0x150   :  { %v1127_v6 = vadd.s32 4294967294, %v294_v4  ;;  %v680_v4 = vld [vmem:[#allocation10 + $0x88] sm:$0xff] }
 0x152   :  { %vm1128_vm8 = vcmp.lt.s32.totalorder %v1127_v6, 0 }
 0x153   :  { %v297_v7 = vsel %vm1128_vm8, 0, %v1127_v6  ;;  %v664_v6 = vld [vmem:[#allocation10 + $0x8] sm:$0xff] }
 0x154   :  { %v298_v9 = vsub.s32 32, %v297_v7  ;;  %v302_v10 = vsub.s32 4294967266, %v297_v7  ;;  %v299_v12 = vshll.u32 %v290_v1, %v297_v7  ;;  %v666_v1 = vld [vmem:[#allocation10 + $0x18] sm:$0xff]  ;;  %v679_v7 = vld [vmem:[#allocation10 + $0x80] sm:$0xff] }
 0x156   :  { %v300_v13 = vshrl.u32 %v282_v8, %v298_v9  ;;  %v303_v14 = vadd.s32 127, %v302_v10  ;;  %v663_v8 = vld [vmem:[#allocation10] sm:$0xff]  ;;  %v803_v9 = vld [vmem:[#allocation11 + $0xf8] sm:$0xff]  ;;  %v802_v10 = vld [vmem:[#allocation11 + $0xf0] sm:$0xff] }
 0x157   :  { %816 = vmatprep.subr.mxu0 %v803_v9 }
 0x158   :  { %v301_v15 = vor.u32 %v300_v13, %v299_v12  ;;  %v304_v16 = vshll.u32 %v303_v14, 23  ;;  %v801_v12 = vld [vmem:[#allocation11 + $0xe8] sm:$0xff]  ;;  %v800_v13 = vld [vmem:[#allocation11 + $0xe0] sm:$0xff]  ;;  %v799_v14 = vld [vmem:[#allocation11 + $0xd8] sm:$0xff] }
 0x15a   :  { %v305_v17 = vor.u32 4788187, %v304_v16  ;;  %v308_v19 = vcvt.s32.f32 %v301_v15  ;;  %v798_v15 = vld [vmem:[#allocation11 + $0xd0] sm:$0xff]  ;;  %v797_v16 = vld [vmem:[#allocation11 + $0xc8] sm:$0xff] }
 0x15c   :  { %v306_v18 = vand.u32 2147483647, %v305_v17  ;;  %v796_v17 = vld [vmem:[#allocation11 + $0xc0] sm:$0xff] }
 0x15e   :  { %v309_v20 = vmul.f32 %v308_v19, %v306_v18  ;;  %v795_v18 = vld [vmem:[#allocation11 + $0xb8] sm:$0xff]  ;;  %v794_v19 = vld [vmem:[#allocation11 + $0xb0] sm:$0xff] }
 0x160   :  { %v310_v21 = vxor.u32 2147483648, %v309_v20 }
 0x162   :  { %v311_v23 = vsel %vm228_vm9, %v310_v21, %v309_v20  ;;  %v793_v20 = vld [vmem:[#allocation11 + $0xa8] sm:$0xff]  ;;  %v792_v21 = vld [vmem:[#allocation11 + $0xa0] sm:$0xff] }
 0x163   :  { %v314_v24 = vsel %vm227_vm10, %v1625_v5, %v311_v23  ;;  %v675_v5 = vld [vmem:[#allocation10 + $0x60] sm:$0xff]  ;;  %v790_v23 = vld [vmem:[#allocation11 + $0x90] sm:$0xff] }
 0x164   :  { %1290 = vcosq.f32 %v314_v24 }
 0x165   :  { %1292 = vsinq.f32 %v314_v24  ;;  %v789_v24 = vld [vmem:[#allocation11 + $0x88] sm:$0xff] }
 0x171   :  { %v1291_v30 = vpop.eup %1290 }
 0x172   :  { %v1293_v31 = vpop.eup %1292  ;;  %v326_v32 = vxor.u32 2147483648, %v1291_v30 }
 0x173   :  { %v323_v33 = vxor.u32 2147483648, %v1293_v31 }
 0x174   :  { %v462_v34 = vsel %vm460_vm11, %v326_v32, %v1293_v31  ;;  %v327_v11 = vsel %vm325_vm12, %v326_v32, %v1293_v31  ;;  %v782_v31 = vld [vmem:[#allocation11 + $0x50] sm:$0xff]  ;;  %v781_v32 = vld [vmem:[#allocation11 + $0x48] sm:$0xff] }
 0x175   :  { %v459_v35 = vsel %vm457_vm13, %v1291_v30, %v323_v33  ;;  %v324_v36 = vsel %vm322_vm14, %v1291_v30, %v323_v33  ;;  %v783_v30 = vld [vmem:[#allocation11 + $0x58] sm:$0xff]  ;;  %v780_v33 = vld [vmem:[#allocation11 + $0x40] sm:$0xff] }
 0x176   :  { %v463_v37 = vsel %vm456_vm15, %v459_v35, %v462_v34  ;;  %v328_v38 = vsel %vm321_vm1, %v324_v36, %v327_v11  ;;  %v779_v34 = vld [vmem:[#allocation11 + $0x38] sm:$0xff]  ;;  %v641_v11 = vlaneseq }
 0x177   :  { %v464_v40 = vsel %vm318_vm2, nan, %v463_v37  ;;  %v329_v41 = vsel %vm318_vm2, nan, %v328_v38  ;;  %v639_v37 = vld [vmem:[%s1699_s4] sm:$0x3] }
 0x178   :  { %562 = vmatmul.mubr.f32.vlgmr.msra.gmra.mxu1 %v464_v40  ;;  %633 = vmatmul.mubr.f32.vlgmr.msra.gmra.mxu0 %v329_v41  ;;  %v1647_v35 = vshrl.u32 %v641_v11, 7  ;;  %v915_v11 = vld [vmem:[#allocation13 + $0x90] sm:$0xff] }
 0x179   :  { %1139 = vmatpush3.msra.mxu1 %v678_v39  ;;  %880 = vmatprep.mubr.f32.mxu0 %v1508_v0 }
 0x17a   :  { %1140 = vmatprep.subr.mxu1 %v693_v42  ;;  %817 = vmatpush1.msra.mxu0 %v802_v10  ;;  %v643_v36 = vsub.s32 0, %v1647_v35  ;;  %v647_v38 = vsub.s32 1, %v1647_v35  ;;  %v1133_v10 = vld [vmem:[%s1701_s6] ss:$0 sm:$0xff]  ;;  %v1024_v35 = vld [vmem:[#allocation14 + $0x68] sm:$0xff] }
 0x17b   :  { %1141 = vmatpush3.msra.mxu1 %v677_v43  ;;  %818 = vmatprep.subr.mxu0 %v801_v12 }
 0x17c   :  { %1142 = vmatprep.subr.mxu1 %v692_v44  ;;  %819 = vmatpush1.msra.mxu0 %v800_v13  ;;  %v644_v39 = vrot.slane %v639_v37, %v643_v36  ;;  %v648_v43 = vrot.slane %v639_v37, %v647_v38  ;;  %v899_v37 = vld [vmem:[#allocation13 + $0x10] sm:$0xff] }
 0x17d   :  { %1143 = vmatpush3.msra.mxu1 %v676_v45  ;;  %820 = vmatprep.subr.mxu0 %v799_v14 }
 0x17e   :  { %1144 = vmatprep.subr.mxu1 %v691_v46  ;;  %821 = vmatpush1.msra.mxu0 %v798_v15  ;;  %v925_v15 = vld [vmem:[#allocation13 + $0xe0] sm:$0xff] }
 0x17f   :  { %1145 = vmatpush3.msra.mxu1 %v675_v5  ;;  %822 = vmatprep.subr.mxu0 %v797_v16  ;;  %v909_v16 = vld [vmem:[#allocation13 + $0x60] sm:$0xff] }
 0x180   :  { %1146 = vmatprep.subr.mxu1 %v690_v47  ;;  %823 = vmatpush1.msra.mxu0 %v796_v17  ;;  %v924_v17 = vld [vmem:[#allocation13 + $0xd8] sm:$0xff] }
 0x181   :  { %1147 = vmatpush3.msra.mxu1 %v674_v48  ;;  %824 = vmatprep.subr.mxu0 %v795_v18  ;;  %v908_v18 = vld [vmem:[#allocation13 + $0x58] sm:$0xff] }
 0x182   :  { %1148 = vmatprep.subr.mxu1 %v689_v49  ;;  %825 = vmatpush1.msra.mxu0 %v794_v19  ;;  %v923_v19 = vld [vmem:[#allocation13 + $0xd0] sm:$0xff] }
 0x183   :  { %1149 = vmatpush3.msra.mxu1 %v673_v50  ;;  %826 = vmatprep.subr.mxu0 %v793_v20  ;;  %v907_v20 = vld [vmem:[#allocation13 + $0x50] sm:$0xff] }
 0x184   :  { %1150 = vmatprep.subr.mxu1 %v688_v51  ;;  %827 = vmatpush1.msra.mxu0 %v792_v21  ;;  %v922_v21 = vld [vmem:[#allocation13 + $0xc8] sm:$0xff] }
 0x185   :  { %1151 = vmatpush3.msra.mxu1 %v672_v52  ;;  %828 = vmatprep.subr.mxu0 %v791_v22  ;;  %v906_v22 = vld [vmem:[#allocation13 + $0x48] sm:$0xff] }
 0x186   :  { %1152 = vmatprep.subr.mxu1 %v687_v53  ;;  %829 = vmatpush1.msra.mxu0 %v790_v23  ;;  %v921_v23 = vld [vmem:[#allocation13 + $0xc0] sm:$0xff] }
 0x187   :  { %1153 = vmatpush3.msra.mxu1 %v671_v54  ;;  %830 = vmatprep.subr.mxu0 %v789_v24  ;;  %v905_v24 = vld [vmem:[#allocation13 + $0x40] sm:$0xff] }
 0x188   :  { %1154 = vmatprep.subr.mxu1 %v686_v55  ;;  %831 = vmatpush1.msra.mxu0 %v788_v25  ;;  %v920_v25 = vld [vmem:[#allocation13 + $0xb8] sm:$0xff] }
 0x189   :  { %1155 = vmatpush3.msra.mxu1 %v670_v56  ;;  %832 = vmatprep.subr.mxu0 %v787_v26  ;;  %v904_v26 = vld [vmem:[#allocation13 + $0x38] sm:$0xff] }
 0x18a   :  { %1156 = vmatprep.subr.mxu1 %v685_v57  ;;  %833 = vmatpush1.msra.mxu0 %v786_v27  ;;  %v919_v27 = vld [vmem:[#allocation13 + $0xb0] sm:$0xff] }
 0x18b   :  { %1157 = vmatpush3.msra.mxu1 %v669_v58  ;;  %834 = vmatprep.subr.mxu0 %v785_v28  ;;  %v778_v58 = vld [vmem:[#allocation11 + $0x30] sm:$0xff] }
 0x18c   :  { %1158 = vmatprep.subr.mxu1 %v684_v59  ;;  %835 = vmatpush1.msra.mxu0 %v784_v29  ;;  %v777_v59 = vld [vmem:[#allocation11 + $0x28] sm:$0xff]  ;;  %v903_v28 = vld [vmem:[#allocation13 + $0x30] sm:$0xff] }
 0x18d   :  { %1159 = vmatpush3.msra.mxu1 %v668_v60  ;;  %836 = vmatprep.subr.mxu0 %v783_v30  ;;  %v776_v60 = vld [vmem:[#allocation11 + $0x20] sm:$0xff]  ;;  %v918_v29 = vld [vmem:[#allocation13 + $0xa8] sm:$0xff] }
 0x18e   :  { %1160 = vmatprep.subr.mxu1 %v683_v61  ;;  %837 = vmatpush1.msra.mxu0 %v782_v31  ;;  %v775_v61 = vld [vmem:[#allocation11 + $0x18] sm:$0xff]  ;;  %v902_v30 = vld [vmem:[#allocation13 + $0x28] sm:$0xff]  ;;  %v917_v31 = vld [vmem:[#allocation13 + $0xa0] sm:$0xff] }
 0x18f   :  { %1161 = vmatpush3.msra.mxu1 %v667_v62  ;;  %838 = vmatprep.subr.mxu0 %v781_v32  ;;  %v774_v62 = vld [vmem:[#allocation11 + $0x10] sm:$0xff]  ;;  %v901_v32 = vld [vmem:[#allocation13 + $0x20] sm:$0xff] }
 0x190   :  { %1162 = vmatprep.subr.mxu1 %v682_v63  ;;  %839 = vmatpush1.msra.mxu0 %v780_v33  ;;  %v773_v63 = vld [vmem:[#allocation11 + $0x8] sm:$0xff]  ;;  %v916_v33 = vld [vmem:[#allocation13 + $0x98] sm:$0xff] }
 0x191   :  { %1163 = vmatpush3.msra.mxu1 %v666_v1  ;;  %840 = vmatprep.subr.mxu0 %v779_v34  ;;  %v772_v1 = vld [vmem:[#allocation11] sm:$0xff]  ;;  %v900_v34 = vld [vmem:[#allocation13 + $0x18] sm:$0xff] }
 0x192   :  { %1164 = vmatprep.subr.mxu1 %v681_v2  ;;  %841 = vmatpush1.msra.mxu0 %v778_v58  ;;  %v928_v2 = vld [vmem:[#allocation13 + $0xf8] sm:$0xff] }
 0x193   :  { %1165 = vmatpush3.msra.mxu1 %v665_v3  ;;  %842 = vmatprep.subr.mxu0 %v777_v59  ;;  %v912_v3 = vld [vmem:[#allocation13 + $0x78] sm:$0xff] }
 0x194   :  { %1166 = vmatprep.subr.mxu1 %v680_v4  ;;  %843 = vmatpush1.msra.mxu0 %v776_v60  ;;  %v927_v4 = vld [vmem:[#allocation13 + $0xf0] sm:$0xff] }
 0x195   :  { %1167 = vmatpush3.msra.mxu1 %v664_v6  ;;  %844 = vmatprep.subr.mxu0 %v775_v61  ;;  %v911_v6 = vld [vmem:[#allocation13 + $0x70] sm:$0xff] }
 0x196   :  { %1168 = vmatprep.subr.mxu1 %v679_v7  ;;  %845 = vmatpush1.msra.mxu0 %v774_v62  ;;  %v926_v7 = vld [vmem:[#allocation13 + $0xe8] sm:$0xff]  ;;  %v1021_v61 = vld [vmem:[#allocation14 + $0x50] sm:$0xff] }
 0x197   :  { %1169 = vmatpush3.msra.mxu1 %v663_v8  ;;  %846 = vmatprep.subr.mxu0 %v773_v63  ;;  %v910_v8 = vld [vmem:[#allocation13 + $0x68] sm:$0xff]  ;;  %v1019_v63 = vld [vmem:[#allocation14 + $0x40] sm:$0xff] }
 0x198   :  { %847 = vmatpush1.msra.mxu0 %v772_v1  ;;  %1173 = vmatprep.subr.mxu1 %v928_v2  ;;  %v1020_v62 = vld [vmem:[#allocation14 + $0x48] sm:$0xff]  ;;  %v1018_v1 = vld [vmem:[#allocation14 + $0x38] sm:$0xff]  ;;  %v1017_v2 = vld [vmem:[#allocation14 + $0x30] sm:$0xff] }
 0x199   :  { %1230 = vmatprep.subr.mxu0 %v1508_v0 }
 0x238   :  { %v563_v40 = vpop.f32.mrf.mxu1  ;;  %v634_v41 = vpop.f32.mrf.mxu0 }
 0x239   :  { %v635_v42 = vadd.f32 %v634_v41, %v563_v40  ;;  %v898_v40 = vld [vmem:[#allocation13 + $0x8] sm:$0xff]  ;;  %v913_v41 = vld [vmem:[#allocation13 + $0x80] sm:$0xff] }
 0x23a   :  { %v565_v44 = vpop.f32.mrf.mxu1  ;;  %v636_v45 = vpop.f32.mrf.mxu0 }
 0x23b   :  { %v651_v46 = vadd.f32 %v644_v39, %v635_v42  ;;  %v637_v5 = vadd.f32 %v636_v45, %v565_v44  ;;  %v914_v39 = vld [vmem:[#allocation13 + $0x88] sm:$0xff]  ;;  %v897_v42 = vld [vmem:[#allocation13] sm:$0xff]  ;;  %v1025_v44 = vld [vmem:[#allocation14 + $0x70] sm:$0xff] }
 0x23c   :  { %v804_v45 = vld [vmem:[%s1703_s8] sm:$0x3] }
 0x23d   :  { %v655_v47 = vmul.f32 0.70710677, %v651_v46  ;;  %v652_v48 = vadd.f32 %v648_v43, %v637_v5  ;;  %v653_v55 = vmul.f32 0.5, %v651_v46  ;;  %v1026_v43 = vld [vmem:[#allocation14 + $0x78] sm:$0xff]  ;;  %v809_v46 = vrot.slane %v804_v45, %v643_v36  ;;  %v1023_v36 = vld [vmem:[#allocation14 + $0x60] sm:$0xff] }
 0x23e   :  { %v813_v5 = vrot.slane %v804_v45, %v647_v38  ;;  %v1022_v38 = vld [vmem:[#allocation14 + $0x58] sm:$0xff] }
 0x23f   :  { %1294 = verf.f32 %v655_v47  ;;  %v656_v49 = vmul.f32 0.70710677, %v652_v48  ;;  %v654_v53 = vmul.f32 0.5, %v652_v48 }
 0x241   :  { %1296 = verf.f32 %v656_v49 }
 0x24c   :  { %v1295_v50 = vpop.eup %1294 }
 0x24d   :  { %v659_v52 = vadd.f32 1.0, %v1295_v50 }
 0x24e   :  { %v1297_v51 = vpop.eup %1296 }
 0x24f   :  { %v660_v54 = vadd.f32 1.0, %v1297_v51  ;;  %v661_v57 = vmul.f32 %v659_v52, %v653_v55 }
 0x251   :  { %v662_v56 = vmul.f32 %v660_v54, %v654_v53 }
 0x253   :  { %766 = vmatprep.mubr.f32.mxu1 %v662_v56 }
 0x254   :  { %767 = vmatmul.mubr.f32.vlgmr.msra.gmra.mxu1 %v661_v57 }
 0x255   :  { %1174 = vmatpush3.msra.mxu1 %v912_v3  ;;  %v1016_v3 = vld [vmem:[#allocation14 + $0x28] sm:$0xff] }
 0x256   :  { %1175 = vmatprep.subr.mxu1 %v927_v4  ;;  %v1015_v4 = vld [vmem:[#allocation14 + $0x20] sm:$0xff] }
 0x257   :  { %1176 = vmatpush3.msra.mxu1 %v911_v6  ;;  %v1014_v6 = vld [vmem:[#allocation14 + $0x18] sm:$0xff] }
 0x258   :  { %1177 = vmatprep.subr.mxu1 %v926_v7  ;;  %v1013_v7 = vld [vmem:[#allocation14 + $0x10] sm:$0xff] }
 0x259   :  { %1178 = vmatpush3.msra.mxu1 %v910_v8  ;;  %v1012_v8 = vld [vmem:[#allocation14 + $0x8] sm:$0xff] }
 0x25a   :  { %1179 = vmatprep.subr.mxu1 %v925_v15 }
 0x25b   :  { %1180 = vmatpush3.msra.mxu1 %v909_v16 }
 0x25c   :  { %1181 = vmatprep.subr.mxu1 %v924_v17 }
 0x25d   :  { %1182 = vmatpush3.msra.mxu1 %v908_v18 }
 0x25e   :  { %1183 = vmatprep.subr.mxu1 %v923_v19 }
 0x25f   :  { %1184 = vmatpush3.msra.mxu1 %v907_v20 }
 0x260   :  { %1185 = vmatprep.subr.mxu1 %v922_v21 }
 0x261   :  { %1186 = vmatpush3.msra.mxu1 %v906_v22 }
 0x262   :  { %1187 = vmatprep.subr.mxu1 %v921_v23 }
 0x263   :  { %1188 = vmatpush3.msra.mxu1 %v905_v24 }
 0x264   :  { %1189 = vmatprep.subr.mxu1 %v920_v25 }
 0x265   :  { %1190 = vmatpush3.msra.mxu1 %v904_v26 }
 0x266   :  { %1191 = vmatprep.subr.mxu1 %v919_v27 }
 0x267   :  { %1192 = vmatpush3.msra.mxu1 %v903_v28 }
 0x268   :  { %1193 = vmatprep.subr.mxu1 %v918_v29 }
 0x269   :  { %1194 = vmatpush3.msra.mxu1 %v902_v30 }
 0x26a   :  { %1195 = vmatprep.subr.mxu1 %v917_v31 }
 0x26b   :  { %1196 = vmatpush3.msra.mxu1 %v901_v32 }
 0x26c   :  { %1197 = vmatprep.subr.mxu1 %v916_v33 }
 0x26d   :  { %1198 = vmatpush3.msra.mxu1 %v900_v34 }
 0x26e   :  { %1199 = vmatprep.subr.mxu1 %v915_v11 }
 0x26f   :  { %1200 = vmatpush3.msra.mxu1 %v899_v37 }
 0x270   :  { %1201 = vmatprep.subr.mxu1 %v914_v39 }
 0x271   :  { %1202 = vmatpush3.msra.mxu1 %v898_v40 }
 0x272   :  { %1203 = vmatprep.subr.mxu1 %v913_v41 }
 0x273   :  { %1204 = vmatpush3.msra.mxu1 %v897_v42 }
 0x314   :  { %v1170_v9 = vpop.f32.mrf.mxu1 }
 0x316   :  { %v1171_v12 = vpop.f32.mrf.mxu1 }
 0x317   :  { %v1172_v13 = vadd.f32 %v1171_v12, %v1170_v9  ;;  %v1011_v9 = vld [vmem:[#allocation14] sm:$0xff]  ;;  %v1134_v12 = vld [vmem:[%s1705_s10] ss:$0 sm:$0xff]  ;;  %s1464_s10 = scalar_lea.vmem %s1112_s15, 128 }
 0x318   :  { %p1465_p12 = scmp.ne.s32.totalorder %s1112_s15, %s1464_s10  ;;  %p1470_p0 = scmp.lt.s32.totalorder %s1464_s10, %s1464_s10 }
 0x319   :  { %v769_v14 = vadd.f32 %v1172_v13, %v1133_v10 }
 0x31a   :  { %p1471_p1 = por %p1470_p0, %p1469_p13 }
 0x31b   :  { %881 = vmatmul.mubr.f32.vlgmr.msra.gmra.mxu0 %v769_v14 }
 0x31c   :  { %1262 = vmatprep.mubr.msk.f32.mxu0 %vm1509_vm0, %v1508_v0  ;;  %1231 = vmatpush3.msra.mxu0 %v1026_v43  ;;  %p1472_p2 = pnand %p1471_p1, %p1465_p12 }
 0x31d   :  { %1232 = vmatprep.subr.mxu0 %v1508_v0 }
 0x31e   :  { %1233 = vmatpush3.msra.mxu0 %v1025_v44 }
 0x31f   :  { %1234 = vmatprep.subr.mxu0 %v1508_v0 }
 0x320   :  { %1235 = vmatpush3.msra.mxu0 %v1024_v35 }
 0x321   :  { %1236 = vmatprep.subr.mxu0 %v1508_v0 }
 0x322   :  { %1237 = vmatpush3.msra.mxu0 %v1023_v36 }
 0x323   :  { %1238 = vmatprep.subr.mxu0 %v1508_v0 }
 0x324   :  { %1239 = vmatpush3.msra.mxu0 %v1022_v38 }
 0x325   :  { %1240 = vmatprep.subr.mxu0 %v1508_v0 }
 0x326   :  { %1241 = vmatpush3.msra.mxu0 %v1021_v61 }
 0x327   :  { %1242 = vmatprep.subr.mxu0 %v1508_v0 }
 0x328   :  { %1243 = vmatpush3.msra.mxu0 %v1020_v62 }
 0x329   :  { %1244 = vmatprep.subr.mxu0 %v1508_v0 }
 0x32a   :  { %1245 = vmatpush3.msra.mxu0 %v1019_v63 }
 0x32b   :  { %1246 = vmatprep.subr.mxu0 %v1508_v0 }
 0x32c   :  { %1247 = vmatpush3.msra.mxu0 %v1018_v1 }
 0x32d   :  { %1248 = vmatprep.subr.mxu0 %v1508_v0 }
 0x32e   :  { %1249 = vmatpush3.msra.mxu0 %v1017_v2 }
 0x32f   :  { %1250 = vmatprep.subr.mxu0 %v1508_v0 }
 0x330   :  { %1251 = vmatpush3.msra.mxu0 %v1016_v3 }
 0x331   :  { %1252 = vmatprep.subr.mxu0 %v1508_v0 }
 0x332   :  { %1253 = vmatpush3.msra.mxu0 %v1015_v4 }
 0x333   :  { %1254 = vmatprep.subr.mxu0 %v1508_v0 }
 0x334   :  { %1255 = vmatpush3.msra.mxu0 %v1014_v6 }
 0x335   :  { %1256 = vmatprep.subr.mxu0 %v1508_v0 }
 0x336   :  { %1257 = vmatpush3.msra.mxu0 %v1013_v7 }
 0x337   :  { %1258 = vmatprep.subr.mxu0 %v1508_v0 }
 0x338   :  { %1259 = vmatpush3.msra.mxu0 %v1012_v8 }
 0x339   :  { %1260 = vmatprep.subr.mxu0 %v1508_v0  ;;  %v1135_v0 = vld [vmem:[%s1707_s12] ss:$0 sm:$0xff] }
 0x33a   :  { %1261 = vmatpush3.msra.mxu0 %v1011_v9 }
 0x3db   :  { %v882_v47 = vpop.f32.mrf.mxu0 }
 0x3dc   :  { %v883_v48 = vadd.f32 %v882_v47, %v809_v46 }
 0x3dd   :  { %v884_v49 = vpop.f32.mrf.mxu0 }
 0x3de   :  { %v889_v50 = vmul.f32 0.70710677, %v883_v48  ;;  %v885_v51 = vadd.f32 %v884_v49, %v813_v5  ;;  %v887_v58 = vmul.f32 0.5, %v883_v48 }
 0x3e0   :  { %1298 = verf.f32 %v889_v50  ;;  %v890_v52 = vmul.f32 0.70710677, %v885_v51  ;;  %v888_v56 = vmul.f32 0.5, %v885_v51 }
 0x3e2   :  { %1300 = verf.f32 %v890_v52 }
 0x3ed   :  { %v1299_v53 = vpop.eup %1298 }
 0x3ee   :  { %v893_v55 = vadd.f32 1.0, %v1299_v53 }
 0x3ef   :  { %v1301_v54 = vpop.eup %1300 }
 0x3f0   :  { %v894_v57 = vadd.f32 1.0, %v1301_v54  ;;  %v895_v60 = vmul.f32 %v893_v55, %v887_v58 }
 0x3f2   :  { %v896_v59 = vmul.f32 %v894_v57, %v888_v56 }
 0x3f4   :  { %1000 = vmatprep.mubr.f32.mxu1 %v896_v59 }
 0x3f5   :  { %1001 = vmatmul.mubr.f32.vlgmr.msra.gmra.mxu1 %v895_v60 }
 0x4b5   :  { %v1205_v10 = vpop.f32.mrf.mxu1 }
 0x4b7   :  { %v1206_v13 = vpop.f32.mrf.mxu1 }
 0x4b8   :  { %v1207_v14 = vadd.f32 %v1206_v13, %v1205_v10 }
 0x4ba   :  { %v1003_v15 = vadd.f32 %v1207_v14, %v1134_v12 }
 0x4bc   :  { %v1007_v16 = vmul.f32 0.70710677, %v1003_v15  ;;  %v1006_v18 = vmul.f32 0.5, %v1003_v15 }
 0x4be   :  { %1302 = verf.f32 %v1007_v16 }
 0x4cb   :  { %v1303_v17 = vpop.eup %1302 }
 0x4cc   :  { %v1009_v19 = vadd.f32 1.0, %v1303_v17 }
 0x4ce   :  { %v1010_v20 = vmul.f32 %v1009_v19, %v1006_v18 }
 0x4d0   :  { %1263 = vmatmul.mubr.f32.vlgmr.msra.gmra.mxu0 %v1010_v20 }
 0x590   :  { %v1100_v21 = vpop.f32.mrf.mxu0 }
 0x591   :  { %v1101_v22 = vadd.f32 %v1135_v0, %v1100_v21 }
 0x592   :  { %v1264_v23 = vpop.f32.mrf.mxu0 }
 0x593   :  { %1104 = vst [vmem:[#allocation16] sm:$0xff] %v1101_v22 }
 0x594   :  { %1475 = shalt.err (!%p1472_p2)
}
 0x595   :  { %1114 = dma.vmem_to_hbm [thread:$0]  %s1112_s15, 128, %s1708_s13, [#allocation4]  }
 0x596   :  { %1494 = dma.done.wait [#allocation4], 128  }
 0x597   :  { %1495 = vsyncadd [#allocation4], 4294967168 }
 0x598   :  { %1118 = vsyncpa [#allocation3], 1 }
 0x599   :  { %1119 = vsyncpa [#allocation6], 1 }
 0x59a   :  { %1120 = vsyncpa [#allocation9], 1 }
 0x59b   :  { %1121 = vsyncpa [#allocation12], 1 }
 0x59c   :  { %1122 = vsyncpa [#allocation15], 1 }
 0x59d   :  { %1123 = vsyncpa [#allocation4], 1 }

</bundles_post_ra>
